<compile_context>
chip_gen: v5e
topology: v5e:2x2
jax: 0.10.0
libtpu: 0.0.40
codegen_flags: <defaults>
</compile_context>

<pallas_src>
import math

import jax
import jax.numpy as jnp
from jax import lax
from jax.experimental import pallas as pl
from jax.experimental.pallas import tpu as pltpu


def _round_up(x, m):
    return ((x + m - 1) // m) * m


def _linear_relu_kernel(x_ref, w_ref, b_ref, o_ref, acc_ref):
    # x_ref: (tm, tk)  w_ref: (tn, tk)  b_ref: (1, tn)  o_ref: (tm, tn)
    k = pl.program_id(2)

    @pl.when(k == 0)
    def _init():
        acc_ref[...] = jnp.zeros_like(acc_ref)

    # Contract on the K axis of both operands: (tm, tk) · (tn, tk) -> (tm, tn).
    # MXU handles the implicit weight transpose; f32 accumulation.
    acc_ref[...] += lax.dot_general(
        x_ref[...], w_ref[...],
        dimension_numbers=(((1,), (1,)), ((), ())),
        preferred_element_type=jnp.float32)

    @pl.when(k == pl.num_programs(2) - 1)
    def _finalize():
        out = acc_ref[...] + b_ref[...].astype(jnp.float32)
        o_ref[...] = jnp.maximum(out, 0.0).astype(o_ref.dtype)


def relu_layer(x, weight, bias, *, tile_m=512, tile_n=256, tile_k=512):
    """relu(x @ weight.T + bias) with a Pallas TPU kernel.

    x:      (M, in_features)              float32
    weight: (out_features, in_features)   -- PyTorch nn.Linear layout (no .T here)
    bias:   (out_features,)
    """
    M, K = x.shape
    N, K2 = weight.shape
    assert K == K2 and bias.shape == (N,)
    out_dtype = x.dtype

    # ---- lane-dense output: pad N to a multiple of 128, slice off at the end ----
    N_pad = _round_up(N, 128)
    tn = min(tile_n, N_pad)
    if N_pad % tn:
        tn = 128                              # N_pad is always a multiple of 128

    # ---- K tiling only when K is large; zero-pad so the reduction stays exact ----
    if K <= tile_k:
        tk, K_pad = K, K                      # full-K block (== array dim, legal)
    else:
        tk = tile_k
        K_pad = _round_up(K, tk)

    # ---- M tiling: full rows when small, otherwise 512-row blocks (mult. of 8) ----
    tm = M if M <= tile_m else tile_m

    w_p, b_p = weight, bias
    if N_pad != N or K_pad != K:
        w_p = jnp.zeros((N_pad, K_pad), weight.dtype).at[:N, :K].set(weight)
        b_p = jnp.zeros((N_pad,), bias.dtype).at[:N].set(bias)
    x_p = x
    if K_pad != K:
        x_p = jnp.zeros((M, K_pad), x.dtype).at[:, :K].set(x)
    b_p = b_p.reshape(1, N_pad)

    # Grid order (N, M, K): K innermost for the accumulator; weight block index
    # (n, k) does not change across the M axis, so the weight tile stays resident
    # in VMEM for the whole M sweep when K fits in one block.
    grid = (N_pad // tn, pl.cdiv(M, tm), K_pad // tk)

    out_padded = pl.pallas_call(
        _linear_relu_kernel,
        out_shape=jax.ShapeDtypeStruct((M, N_pad), out_dtype),
        grid_spec=pltpu.PrefetchScalarGridSpec(
            num_scalar_prefetch=0,
            grid=grid,
            in_specs=[
                pl.BlockSpec((tm, tk), lambda n, m, k: (m, k)),   # activations
                pl.BlockSpec((tn, tk), lambda n, m, k: (n, k)),   # weight (N,K)
                pl.BlockSpec((1, tn), lambda n, m, k: (0, n)),    # bias
            ],
            out_specs=pl.BlockSpec((tm, tn), lambda n, m, k: (m, n)),
            scratch_shapes=[pltpu.VMEM((tm, tn), jnp.float32)],
        ),
        compiler_params=pltpu.CompilerParams(
            dimension_semantics=("parallel", "parallel", "arbitrary"),
            vmem_limit_bytes=32 * 1024 * 1024),
        cost_estimate=pl.CostEstimate(
            flops=2 * M * N_pad * K_pad,
            transcendentals=0,
            bytes_accessed=4 * (M * K_pad + N_pad * K_pad + M * N_pad)),
    )(x_p, w_p, b_p)

    return out_padded[:, :N] if N_pad != N else out_padded


def init_relu_layer_params(key, in_features, out_features):
    """Deterministic init matching nn.Linear defaults:
    U(-1/sqrt(in_features), 1/sqrt(in_features)) for weight and bias."""
    kw, kb = jax.random.split(key)
    bound = 1.0 / math.sqrt(in_features)
    weight = jax.random.uniform(
        kw, (out_features, in_features), jnp.float32, -bound, bound)
    bias = jax.random.uniform(
        kb, (out_features,), jnp.float32, -bound, bound)
    return weight, bias


if __name__ == "__main__":
    key = jax.random.PRNGKey(0)
    k_x, k_p = jax.random.split(key)

    in_features, out_features = 32, 64
    batch = 8                               # (batch, in_features) = (8, 32)

    x = jax.random.normal(k_x, (batch, in_features), jnp.float32)
    weight, bias = init_relu_layer_params(k_p, in_features, out_features)

    out = jax.block_until_ready(relu_layer(x, weight, bias))

    # Reference in plain JAX (same math as torch: relu(x @ W.T + b)).
    ref = jnp.maximum(x @ weight.T + bias, 0.0)
    assert out.shape == (batch, out_features)
    assert jnp.allclose(out, ref, atol=1e-5, rtol=1e-5)

    print("KERNEL_OK")
</pallas_src>

<mosaic_0001>
module attributes {stable_mosaic.version = 11 : i64} {
  func.func @_linear_relu_kernel(%arg0: i32, %arg1: i32, %arg2: i32, %arg3: memref<8x32xf32, #tpu.memory_space<vmem>>, %arg4: memref<128x32xf32, #tpu.memory_space<vmem>>, %arg5: memref<1x128xf32, #tpu.memory_space<vmem>>, %arg6: memref<8x128xf32, #tpu.memory_space<vmem>>, %arg7: memref<8x128xf32, #tpu.memory_space<vmem>>) attributes {dimension_semantics = [#tpu.dimension_semantics<parallel>, #tpu.dimension_semantics<parallel>, #tpu.dimension_semantics<arbitrary>], iteration_bounds = array<i64: 1, 1, 1>, scalar_prefetch = 0 : i64, scratch_operands = 1 : i64, tpu.core_type = #tpu.core_type<tc>, window_params = [{transform_indices = @transform_0, window_bounds = array<i64: 8, 32>}, {transform_indices = @transform_1, window_bounds = array<i64: 128, 32>}, {transform_indices = @transform_2, window_bounds = array<i64: 1, 128>}, {transform_indices = @transform_3, window_bounds = array<i64: 8, 128>}]} {
    %c0_i32 = arith.constant 0 : i32
    %0 = arith.cmpi eq, %arg2, %c0_i32 : i32
    %1 = arith.extui %0 : i1 to i32
    %c0_i32_0 = arith.constant 0 : i32
    %2 = arith.cmpi ne, %1, %c0_i32_0 : i32
    scf.if %2 {
      %cst_10 = arith.constant 0.000000e+00 : f32
      %12 = vector.broadcast %cst_10 : f32 to vector<8x128xf32>
      %c0_11 = arith.constant 0 : index
      %c0_12 = arith.constant 0 : index
      %13 = vector.load %arg7[%c0_11, %c0_12] : memref<8x128xf32, #tpu.memory_space<vmem>>, vector<8x128xf32>
      tpu.vector_store %arg7[%c0_11, %c0_12], %12 {strides = array<i32>} : memref<8x128xf32, #tpu.memory_space<vmem>>, vector<8x128xf32>,
    } else {
    }
    %c0 = arith.constant 0 : index
    %c0_1 = arith.constant 0 : index
    %3 = vector.load %arg7[%c0, %c0_1] : memref<8x128xf32, #tpu.memory_space<vmem>>, vector<8x128xf32>
    %c0_2 = arith.constant 0 : index
    %c0_3 = arith.constant 0 : index
    %4 = vector.load %arg3[%c0_2, %c0_3] : memref<8x32xf32, #tpu.memory_space<vmem>>, vector<8x32xf32>
    %c0_4 = arith.constant 0 : index
    %c0_5 = arith.constant 0 : index
    %5 = vector.load %arg4[%c0_4, %c0_5] : memref<128x32xf32, #tpu.memory_space<vmem>>, vector<128x32xf32>
    %cst = arith.constant dense<0.000000e+00> : vector<8x128xf32>
    %6 = tpu.matmul %4, %5, %cst {dimension_numbers = #tpu.dot_dimension_numbers<[1], [1], [0], [0], [0, 0, 1, 0], [], []>} : vector<8x32xf32>, vector<128x32xf32>, vector<8x128xf32> -> vector<8x128xf32>
    %7 = arith.addf %3, %6 : vector<8x128xf32>
    %c0_6 = arith.constant 0 : index
    %c0_7 = arith.constant 0 : index
    %8 = vector.load %arg7[%c0_6, %c0_7] : memref<8x128xf32, #tpu.memory_space<vmem>>, vector<8x128xf32>
    tpu.vector_store %arg7[%c0_6, %c0_7], %7 {strides = array<i32>} : memref<8x128xf32, #tpu.memory_space<vmem>>, vector<8x128xf32>,
    %c0_i32_8 = arith.constant 0 : i32
    %9 = arith.cmpi eq, %arg2, %c0_i32_8 : i32
    %10 = arith.extui %9 : i1 to i32
    %c0_i32_9 = arith.constant 0 : i32
    %11 = arith.cmpi ne, %10, %c0_i32_9 : i32
    scf.if %11 {
      %c0_10 = arith.constant 0 : index
      %c0_11 = arith.constant 0 : index
      %12 = vector.load %arg7[%c0_10, %c0_11] : memref<8x128xf32, #tpu.memory_space<vmem>>, vector<8x128xf32>
      %c0_12 = arith.constant 0 : index
      %c0_13 = arith.constant 0 : index
      %13 = vector.load %arg5[%c0_12, %c0_13] : memref<1x128xf32, #tpu.memory_space<vmem>>, vector<1x128xf32>
      %14 = vector.broadcast %13 : vector<1x128xf32> to vector<8x128xf32>
      %15 = arith.addf %12, %14 : vector<8x128xf32>
      %cst_14 = arith.constant 0.000000e+00 : f32
      %16 = vector.broadcast %cst_14 : f32 to vector<8x128xf32>
      %17 = arith.maximumf %15, %16 : vector<8x128xf32>
      %c0_15 = arith.constant 0 : index
      %c0_16 = arith.constant 0 : index
      %18 = vector.load %arg6[%c0_15, %c0_16] : memref<8x128xf32, #tpu.memory_space<vmem>>, vector<8x128xf32>
      tpu.vector_store %arg6[%c0_15, %c0_16], %17 {strides = array<i32>} : memref<8x128xf32, #tpu.memory_space<vmem>>, vector<8x128xf32>,
    } else {
    }
    return
  }
  func.func @transform_0(%arg0: i32, %arg1: i32, %arg2: i32) -> (i32, i32) {
    %c0_i32 = arith.constant 0 : i32
    return %arg1, %arg2 : i32, i32
  }
  func.func @transform_1(%arg0: i32, %arg1: i32, %arg2: i32) -> (i32, i32) {
    %c0_i32 = arith.constant 0 : i32
    return %arg0, %arg2 : i32, i32
  }
  func.func @transform_2(%arg0: i32, %arg1: i32, %arg2: i32) -> (i32, i32) {
    %c0_i32 = arith.constant 0 : i32
    %c0_i32_0 = arith.constant 0 : i32
    return %c0_i32, %arg0 : i32, i32
  }
  func.func @transform_3(%arg0: i32, %arg1: i32, %arg2: i32) -> (i32, i32) {
    %c0_i32 = arith.constant 0 : i32
    return %arg1, %arg0 : i32, i32
  }
}

</mosaic_0001>

<bundles_post_ra>
// kernel: tpu_custom_call.1
= control target key start
LH: loop header
LB: loop body
LE: loop exit
PB: predicated region body
PF: predicated region fallthrough
CT: control target
= control target key end

     0   :  { %vm38_vm0 = vcmask 261120   ;;  %s279_s0 = inlined_call_operand.vmem [shape: f32[8,32], index: 0, kind: input, shape index: {}]   ;;  %s280_s1 = inlined_call_operand.vmem [shape: f32[128,32], index: 1, kind: input, shape index: {}]   ;;  %s281_s2 = inlined_call_operand.vmem [shape: f32[1,128], index: 2, kind: input, shape index: {}]   ;;  %s282_s3 = inlined_call_operand.hbm [shape: f32[8,128], index: 3, kind: output, shape index: {}]  }
   0x1   :  { %v37_v0 = vld [vmem:[%s280_s1 + $0x78] sm:$0xff]  ;;  %v36_v1 = vld [vmem:[%s280_s1 + $0x70] sm:$0xff] }
   0x2   :  { %139 = vmatpush.xpose.msk.msra.mxu0 %vm38_vm0, %v37_v0 }
   0x3   :  { %8 = vsyncpa [#allocation4], 0  ;;  %v35_v2 = vld [vmem:[%s280_s1 + $0x68] sm:$0xff]  ;;  %v34_v3 = vld [vmem:[%s280_s1 + $0x60] sm:$0xff]  ;;  %s184_s21 = smov [#allocation3]   ;;  %s130_s25 = sshll.u32 %s282_s3, 4  ;;  %s131_s25 = int_to_ptr.hbm [resolvable:$true] %s130_s25 }
   0x4   :  { %v33_v4 = vld [vmem:[%s280_s1 + $0x58] sm:$0xff]  ;;  %v32_v5 = vld [vmem:[%s280_s1 + $0x50] sm:$0xff]  ;;  %v31_v6 = vld [vmem:[%s280_s1 + $0x48] sm:$0xff]  ;;  %s128_s22 = sshll.u32 %s184_s21, 4  ;;  %s129_s22 = int_to_ptr.vmem [resolvable:$true] %s128_s22 }
   0x5   :  { %v30_v7 = vld [vmem:[%s280_s1 + $0x40] sm:$0xff]  ;;  %v29_v8 = vld [vmem:[%s280_s1 + $0x38] sm:$0xff]  ;;  %v28_v9 = vld [vmem:[%s280_s1 + $0x30] sm:$0xff] }
   0x6   :  { %140 = vmatpush.xpose.msk.msra.mxu0 %vm38_vm0, %v36_v1  ;;  %v27_v10 = vld [vmem:[%s280_s1 + $0x28] sm:$0xff]  ;;  %v26_v11 = vld [vmem:[%s280_s1 + $0x20] sm:$0xff]  ;;  %v25_v12 = vld [vmem:[%s280_s1 + $0x18] sm:$0xff] }
   0x7   :  { %v24_v13 = vld [vmem:[%s280_s1 + $0x10] sm:$0xff]  ;;  %v23_v14 = vld [vmem:[%s280_s1 + $0x8] sm:$0xff]  ;;  %v22_v15 = vld [vmem:[%s280_s1] sm:$0xff] }
   0x8   :  { %v21_v16 = vld [vmem:[%s279_s0] sm:$0xff] }
   0x9   :  { %v157_v17 = vld [vmem:[%s281_s2] ss:$0 sm:$0xff] }
   0xa   :  { %141 = vmatpush.xpose.msk.msra.mxu0 %vm38_vm0, %v35_v2 }
   0xe   :  { %142 = vmatpush.xpose.msk.msra.mxu0 %vm38_vm0, %v34_v3 }
  0x12   :  { %143 = vmatpush.xpose.msk.msra.mxu0 %vm38_vm0, %v33_v4 }
  0x16   :  { %144 = vmatpush.xpose.msk.msra.mxu0 %vm38_vm0, %v32_v5 }
  0x1a   :  { %145 = vmatpush.xpose.msk.msra.mxu0 %vm38_vm0, %v31_v6 }
  0x1e   :  { %146 = vmatpush.xpose.msk.msra.mxu0 %vm38_vm0, %v30_v7 }
  0x22   :  { %147 = vmatpush.xpose.msk.msra.mxu0 %vm38_vm0, %v29_v8 }
  0x26   :  { %148 = vmatpush.xpose.msk.msra.mxu0 %vm38_vm0, %v28_v9 }
  0x2a   :  { %149 = vmatpush.xpose.msk.msra.mxu0 %vm38_vm0, %v27_v10 }
  0x2e   :  { %150 = vmatpush.xpose.msk.msra.mxu0 %vm38_vm0, %v26_v11 }
  0x32   :  { %151 = vmatpush.xpose.msk.msra.mxu0 %vm38_vm0, %v25_v12 }
  0x36   :  { %152 = vmatpush.xpose.msk.msra.mxu0 %vm38_vm0, %v24_v13 }
  0x3a   :  { %153 = vmatpush.xpose.msk.msra.mxu0 %vm38_vm0, %v23_v14 }
  0x3e   :  { %154 = vmatpush.xpose.msk.msra.mxu0 %vm38_vm0, %v22_v15 }
  0x41   :  { %155 = vmatmul.msk.f32.vlgmr.msra.gmra.mxu0 %vm38_vm0, %v21_v16 }
  0xbe   :  { %v107_v18 = vpop.f32.mrf.mxu0 }
  0xbf   :  { %v120_v19 = vadd.f32 %v157_v17, %v107_v18 }
  0xc1   :  { %v121_v20 = vmax.f32 %v120_v19, 0.0 }
  0xc3   :  { %122 = vst [vmem:[#allocation3] sm:$0xff] %v121_v20 }
  0xc4   :  { %133 = dma.vmem_to_hbm [thread:$0]  %s129_s22, 128, %s131_s25, [#allocation4]  }
  0xc5   :  { %182 = dma.done.wait [#allocation4], 128  }
  0xc6   :  { %183 = vsyncadd [#allocation4], 4294967168 }
  0xc7   :  { %138 = vsyncpa [#allocation4], 1 }

</bundles_post_ra>
